<compile_context>
chip_gen: v7x
topology: tpu7x:2x2x1
jax: 0.10.0
libtpu: 0.0.40
codegen_flags: <defaults>
</compile_context>

<pallas_src>
import functools

import jax
import jax.numpy as jnp
from jax.experimental import pallas as pl
from jax.experimental.pallas import tpu as pltpu

_MIB = 1024 * 1024
_STAGE2_VMEM_BUDGET = 40 * _MIB          # v7x-safe working-set cap
_RESIDENT_SUPPORT_BUDGET = 12 * _MIB     # keep support resident only if small


def _round_up(x, m):
    return ((x + m - 1) // m) * m


def _largest_divisor(dim, candidates, fallback):
    for c in candidates:
        if dim % c == 0:
            return c
    return fallback


def _pick_row_tile(n_p, candidates):
    # Largest tile dividing n_p that still leaves >= 2 row tiles (v7x megacore).
    for c in candidates:
        if n_p % c == 0 and n_p // c >= 2:
            return c
    return _largest_divisor(n_p, candidates, 128)


def _pad2(a, rows, cols):
    r, c = a.shape
    return jnp.pad(a, ((0, rows - r), (0, cols - c)))


# ---------------------------------------------------------------------------
# Kernels
# ---------------------------------------------------------------------------
def _support_kernel(x_ref, w_ref, o_ref, acc_ref):
    # support = x @ W  (bf16 operands, f32 accumulation) with a K reduction.
    k = pl.program_id(1)

    @pl.when(k == 0)
    def _():
        acc_ref[...] = jnp.zeros_like(acc_ref)

    acc_ref[...] += jnp.dot(
        x_ref[...], w_ref[...], preferred_element_type=jnp.float32
    )

    @pl.when(k == pl.num_programs(1) - 1)
    def _():
        o_ref[...] = acc_ref[...].astype(o_ref.dtype)


def _adj_matmul_kernel(adj_ref, s_ref, b_ref, o_ref, acc_ref, *,
                       relu, tk, support_resident):
    # out_tile = adj_tile @ support (+ b, relu) with a K reduction over adj cols.
    k = pl.program_id(2)

    @pl.when(k == 0)
    def _():
        acc_ref[...] = jnp.zeros_like(acc_ref)

    if support_resident:
        # support slab is VMEM-resident (DMA'd once per output-column tile);
        # slice the K rows locally instead of re-streaming them from HBM.
        start = pl.multiple_of(k * tk, tk)
        s = s_ref[pl.ds(start, tk), :]
    else:
        s = s_ref[...]

    acc_ref[...] += jnp.dot(
        adj_ref[...], s, preferred_element_type=jnp.float32
    )

    @pl.when(k == pl.num_programs(2) - 1)
    def _():
        out = acc_ref[...] + b_ref[...]        # bias/ReLU once, in the finalize
        if relu:
            out = jnp.maximum(out, 0.0)
        o_ref[...] = out.astype(o_ref.dtype)


# ---------------------------------------------------------------------------
# One GCN layer on pre-padded operands: adj_p @ (x_p @ w_p) + b_p (+ ReLU)
# ---------------------------------------------------------------------------
def _gcn_layer(x_p, adj_p, w_p, b_p, *, relu, out_dtype):
    n_p, f_p = x_p.shape
    o_p = w_p.shape[1]
    out_bytes = int(jnp.dtype(out_dtype).itemsize)

    # ---- Stage 1: support = x @ W (row-tiled, K-tiled for large nfeat) ----
    tm_s = _pick_row_tile(n_p, (512, 256))
    tk_s = _largest_divisor(f_p, (2048, 1024, 512, 256), 128)
    vmem1 = (2 * tm_s * tk_s * 2 + 2 * tk_s * o_p * 2
             + tm_s * o_p * 4 + 2 * tm_s * o_p * 2)
    vmem1 = max(vmem1 + 4 * _MIB, 32 * _MIB)

    support = pl.pallas_call(
        _support_kernel,
        out_shape=jax.ShapeDtypeStruct((n_p, o_p), jnp.bfloat16),
        grid=(n_p // tm_s, f_p // tk_s),
        in_specs=[
            pl.BlockSpec((tm_s, tk_s), lambda i, k: (i, k)),
            pl.BlockSpec((tk_s, o_p), lambda i, k: (k, 0)),
        ],
        out_specs=pl.BlockSpec((tm_s, o_p), lambda i, k: (i, 0)),
        scratch_shapes=[pltpu.VMEM((tm_s, o_p), jnp.float32)],
        compiler_params=pltpu.CompilerParams(
            dimension_semantics=("parallel", "arbitrary"),
            vmem_limit_bytes=int(vmem1)),
        cost_estimate=pl.CostEstimate(
            flops=int(2 * n_p * f_p * o_p),
            transcendentals=0,
            bytes_accessed=int(2 * (n_p * f_p + f_p * o_p + n_p * o_p)),
        ),
    )(x_p, w_p)

    # ---- Stage 2: out = adj @ support + b (+ ReLU), streamed adj tiles ----
    tm = _pick_row_tile(n_p, (1024, 512, 256))
    tn = _largest_divisor(o_p, (512, 256), 128)

    # Keep the whole (n_p, tn) support slab resident if it is small enough;
    # otherwise stream (tk, tn) tiles along the reduction axis.
    support_resident = (2 * n_p * tn * 2) <= _RESIDENT_SUPPORT_BUDGET

    def _vmem_estimate(tk_):
        adj_b = 2 * tm * tk_ * 2                       # double-buffered bf16 adj
        sup_b = (2 * n_p * tn * 2) if support_resident else (2 * tk_ * tn * 2)
        acc_b = tm * tn * 4
        out_b = 2 * tm * tn * out_bytes
        bias_b = 2 * tn * 4
        return adj_b + sup_b + acc_b + out_b + bias_b

    tk = 512
    for cand in (4096, 2048, 1024, 512):
        if n_p % cand == 0 and _vmem_estimate(cand) <= _STAGE2_VMEM_BUDGET:
            tk = cand
            break
    vmem2 = max(_vmem_estimate(tk) + 4 * _MIB, 32 * _MIB)

    if support_resident:
        s_spec = pl.BlockSpec((n_p, tn), lambda i, j, k: (0, j))
    else:
        s_spec = pl.BlockSpec((tk, tn), lambda i, j, k: (k, j))

    out = pl.pallas_call(
        functools.partial(_adj_matmul_kernel, relu=relu, tk=tk,
                          support_resident=support_resident),
        out_shape=jax.ShapeDtypeStruct((n_p, o_p), out_dtype),
        grid=(n_p // tm, o_p // tn, n_p // tk),
        in_specs=[
            pl.BlockSpec((tm, tk), lambda i, j, k: (i, k)),
            s_spec,
            pl.BlockSpec((1, tn), lambda i, j, k: (0, j)),
        ],
        out_specs=pl.BlockSpec((tm, tn), lambda i, j, k: (i, j)),
        scratch_shapes=[pltpu.VMEM((tm, tn), jnp.float32)],
        compiler_params=pltpu.CompilerParams(
            dimension_semantics=("parallel", "parallel", "arbitrary"),
            vmem_limit_bytes=int(vmem2)),
        cost_estimate=pl.CostEstimate(
            flops=int(2 * n_p * n_p * o_p),
            transcendentals=0,
            bytes_accessed=int(
                2 * n_p * n_p + 2 * n_p * o_p + 4 * o_p
                + out_bytes * n_p * o_p),
        ),
    )(adj_p, support, b_p)
    return out


# ---------------------------------------------------------------------------
# Full encoder: pad once, run two layers, slice back
# ---------------------------------------------------------------------------
def prepare_adj(adj, n_pad):
    """Pad + bf16-cast the adjacency once; cache the result across forward
    passes on a static graph and pass it via gcn_encoder(adj_prepared=...)."""
    return _pad2(adj, n_pad, n_pad).astype(jnp.bfloat16)


def padded_num_nodes(n):
    # Pad N to the tile granularity so adj tiles stay wide and lane-dense.
    return _round_up(n, 512)


def gcn_encoder(x, adj, w1, b1, w2, b2, *, dropout=0.0, training=False,
                adj_prepared=None):
    """Two-layer GCN encoder forward (inference-mode dropout = identity)."""
    del dropout  # identity when training=False
    # TODO(synk): training-mode dropout (stateful PRNG mask) not wired in.
    assert not training, "training-mode dropout not implemented"

    n, nfeat = x.shape
    nhid = w1.shape[1]
    nemb = w2.shape[1]

    n_p = padded_num_nodes(n)
    f_p = _round_up(nfeat, 128)
    h_p = _round_up(nhid, 128)
    e_p = _round_up(nemb, 128)

    # Zero padding is mathematically safe: padded adj cols/rows and padded W
    # cols are zero, so padded lanes contribute nothing to the real outputs.
    x_p = _pad2(x, n_p, f_p).astype(jnp.bfloat16)
    adj_p = prepare_adj(adj, n_p) if adj_prepared is None else adj_prepared
    w1_p = _pad2(w1, f_p, h_p).astype(jnp.bfloat16)
    w2_p = _pad2(w2, h_p, e_p).astype(jnp.bfloat16)
    b1_p = jnp.pad(b1, (0, h_p - nhid)).reshape(1, h_p).astype(jnp.float32)
    b2_p = jnp.pad(b2, (0, e_p - nemb)).reshape(1, e_p).astype(jnp.float32)

    # Layer 1: relu(adj @ (x @ W1) + b1); keep bf16 for the next matmul.
    h = _gcn_layer(x_p, adj_p, w1_p, b1_p, relu=True, out_dtype=jnp.bfloat16)
    # Dropout: inference mode (training=False) -> identity.
    # Layer 2: adj @ (h @ W2) + b2; final output in f32.
    out_p = _gcn_layer(h, adj_p, w2_p, b2_p, relu=False, out_dtype=jnp.float32)

    return out_p[:n, :nemb]


# ---------------------------------------------------------------------------
# Reference / init / test
# ---------------------------------------------------------------------------
def _init_gc_params(key, in_f, out_f):
    """Deterministic init mimicking Kipf's uniform(+/- 1/sqrt(out_f))."""
    kw, kb = jax.random.split(key)
    stdv = 1.0 / jnp.sqrt(jnp.float32(out_f))
    w = jax.random.uniform(kw, (in_f, out_f), jnp.float32, -stdv, stdv)
    b = jax.random.uniform(kb, (out_f,), jnp.float32, -stdv, stdv)
    return w, b


def _reference(x, adj, w1, b1, w2, b2):
    hp = jax.lax.Precision.HIGHEST
    h = jnp.maximum(
        jnp.dot(adj, jnp.dot(x, w1, precision=hp), precision=hp) + b1, 0.0)
    return jnp.dot(adj, jnp.dot(h, w2, precision=hp), precision=hp) + b2


if __name__ == "__main__":
    # Small shapes consistent with the module: N nodes, nfeat -> nhid -> nemb.
    N, NFEAT, NHID, NEMB = 64, 32, 32, 16
    DROPOUT = 0.5  # inference mode -> identity

    key = jax.random.PRNGKey(0)
    kx, kadj, k1, k2 = jax.random.split(key, 4)

    x = jax.random.normal(kx, (N, NFEAT), jnp.float32)
    # Row-normalized random graph adjacency (with self-loops).
    a = (jax.random.uniform(kadj, (N, N)) < 0.1).astype(jnp.float32)
    a = a + a.T + jnp.eye(N, dtype=jnp.float32)
    adj = a / jnp.sum(a, axis=1, keepdims=True)

    w1, b1 = _init_gc_params(k1, NFEAT, NHID)
    w2, b2 = _init_gc_params(k2, NHID, NEMB)

    # Hoisted/cached adjacency preparation (static graph across calls).
    adj_prep = jax.block_until_ready(prepare_adj(adj, padded_num_nodes(N)))

    out = gcn_encoder(x, adj, w1, b1, w2, b2, dropout=DROPOUT, training=False,
                      adj_prepared=adj_prep)
    out = jax.block_until_ready(out)

    ref = _reference(x, adj, w1, b1, w2, b2)
    assert out.shape == (N, NEMB)
    # bf16 matmul operands (f32 accumulation) -> loosened tolerance vs f32 ref.
    assert jnp.allclose(out, ref, atol=5e-2, rtol=5e-2), "mismatch vs JAX reference"

    print("KERNEL_OK")
</pallas_src>

<mosaic_0001>
module attributes {stable_mosaic.version = 11 : i64} {
  func.func @_support_kernel(%arg0: i32, %arg1: i32, %arg2: memref<256x128xbf16, #tpu.memory_space<vmem>>, %arg3: memref<128x128xbf16, #tpu.memory_space<vmem>>, %arg4: memref<256x128xbf16, #tpu.memory_space<vmem>>, %arg5: memref<256x128xf32, #tpu.memory_space<vmem>>) attributes {dimension_semantics = [#tpu.dimension_semantics<parallel>, #tpu.dimension_semantics<arbitrary>], iteration_bounds = array<i64: 2, 1>, scalar_prefetch = 0 : i64, scratch_operands = 1 : i64, tpu.core_type = #tpu.core_type<tc>, window_params = [{transform_indices = @transform_0, window_bounds = array<i64: 256, 128>}, {transform_indices = @transform_1, window_bounds = array<i64: 128, 128>}, {transform_indices = @transform_2, window_bounds = array<i64: 256, 128>}]} {
    %c0_i32 = arith.constant 0 : i32
    %0 = arith.cmpi eq, %arg1, %c0_i32 : i32
    %1 = arith.extui %0 : i1 to i32
    %c0_i32_0 = arith.constant 0 : i32
    %2 = arith.cmpi ne, %1, %c0_i32_0 : i32
    scf.if %2 {
      %cst_10 = arith.constant 0.000000e+00 : f32
      %12 = vector.broadcast %cst_10 : f32 to vector<256x128xf32>
      %c0_11 = arith.constant 0 : index
      %c0_12 = arith.constant 0 : index
      %13 = vector.load %arg5[%c0_11, %c0_12] : memref<256x128xf32, #tpu.memory_space<vmem>>, vector<256x128xf32>
      tpu.vector_store %arg5[%c0_11, %c0_12], %12 {strides = array<i32>} : memref<256x128xf32, #tpu.memory_space<vmem>>, vector<256x128xf32>,
    } else {
    }
    %c0 = arith.constant 0 : index
    %c0_1 = arith.constant 0 : index
    %3 = vector.load %arg5[%c0, %c0_1] : memref<256x128xf32, #tpu.memory_space<vmem>>, vector<256x128xf32>
    %c0_2 = arith.constant 0 : index
    %c0_3 = arith.constant 0 : index
    %4 = vector.load %arg2[%c0_2, %c0_3] : memref<256x128xbf16, #tpu.memory_space<vmem>>, vector<256x128xbf16>
    %c0_4 = arith.constant 0 : index
    %c0_5 = arith.constant 0 : index
    %5 = vector.load %arg3[%c0_4, %c0_5] : memref<128x128xbf16, #tpu.memory_space<vmem>>, vector<128x128xbf16>
    %cst = arith.constant dense<0.000000e+00> : vector<256x128xf32>
    %6 = tpu.matmul %4, %5, %cst {dimension_numbers = #tpu.dot_dimension_numbers<[1], [0], [0], [1], [0, 0, 1, 1], [], []>} : vector<256x128xbf16>, vector<128x128xbf16>, vector<256x128xf32> -> vector<256x128xf32>
    %7 = arith.addf %3, %6 : vector<256x128xf32>
    %c0_6 = arith.constant 0 : index
    %c0_7 = arith.constant 0 : index
    %8 = vector.load %arg5[%c0_6, %c0_7] : memref<256x128xf32, #tpu.memory_space<vmem>>, vector<256x128xf32>
    tpu.vector_store %arg5[%c0_6, %c0_7], %7 {strides = array<i32>} : memref<256x128xf32, #tpu.memory_space<vmem>>, vector<256x128xf32>,
    %c0_i32_8 = arith.constant 0 : i32
    %9 = arith.cmpi eq, %arg1, %c0_i32_8 : i32
    %10 = arith.extui %9 : i1 to i32
    %c0_i32_9 = arith.constant 0 : i32
    %11 = arith.cmpi ne, %10, %c0_i32_9 : i32
    scf.if %11 {
      %c0_10 = arith.constant 0 : index
      %c0_11 = arith.constant 0 : index
      %12 = vector.load %arg5[%c0_10, %c0_11] : memref<256x128xf32, #tpu.memory_space<vmem>>, vector<256x128xf32>
      %13 = arith.truncf %12 : vector<256x128xf32> to vector<256x128xbf16>
      %c0_12 = arith.constant 0 : index
      %c0_13 = arith.constant 0 : index
      %14 = vector.load %arg4[%c0_12, %c0_13] : memref<256x128xbf16, #tpu.memory_space<vmem>>, vector<256x128xbf16>
      tpu.vector_store %arg4[%c0_12, %c0_13], %13 {strides = array<i32>} : memref<256x128xbf16, #tpu.memory_space<vmem>>, vector<256x128xbf16>,
    } else {
    }
    return
  }
  func.func @transform_0(%arg0: i32, %arg1: i32) -> (i32, i32) {
    %c0_i32 = arith.constant 0 : i32
    return %arg0, %arg1 : i32, i32
  }
  func.func @transform_1(%arg0: i32, %arg1: i32) -> (i32, i32) {
    %c0_i32 = arith.constant 0 : i32
    %c0_i32_0 = arith.constant 0 : i32
    return %arg1, %c0_i32 : i32, i32
  }
  func.func @transform_2(%arg0: i32, %arg1: i32) -> (i32, i32) {
    %c0_i32 = arith.constant 0 : i32
    %c0_i32_0 = arith.constant 0 : i32
    return %arg0, %c0_i32 : i32, i32
  }
}

</mosaic_0001>

<bundles_post_ra>
// kernel: tpu_custom_call.1
= control target key start
LH: loop header
LB: loop body
LE: loop exit
PB: predicated region body
PF: predicated region fallthrough
CT: control target
= control target key end

     0   :  { %7 = vsyncpa [#allocation4], 0  ;;  %s1818_s0 = inlined_call_operand.hbm [shape: bf16[512,128], index: 0, kind: input, shape index: {}]   ;;  %s1819_s1 = inlined_call_operand.hbm [shape: bf16[128,128], index: 1, kind: input, shape index: {}]   ;;  %s1820_s2 = inlined_call_operand.hbm [shape: bf16[512,128], index: 2, kind: output, shape index: {}]  }
   0x1   :  { %9 = vsyncpa [#allocation4 + $0x1], 0 }
   0x2   :  { %10 = vsyncpa [#allocation7], 0 }
   0x3   :  { %11 = vsyncpa [#allocation5], 0 }
   0x4   :  { %13 = vsyncpa [#allocation5 + $0x1], 0  ;;  %s1552_s9 = smov 0   ;;  %s1554_s10 = smov 0  }
   0x5   :  { %s1556_s11 = smov 0   ;;  %s1558_s12 = smov 0  }
   0x6   :  { %s1560_s13 = smov 0   ;;  %s1562_s14 = smov 0  }
   0x7 LB: > { %s993_s15 = sadd.s32 4294967295, %s1528_s14   ;;  %s994_s16 = sadd.s32 4294967294, %s1528_s14   ;;  %s1528_s14 = sphi %s1562_s14, %s19_s14   ;;  %s1524_s13 = sphi %s1560_s13, %s1844_s13   ;;  %s1520_s12 = sphi %s1558_s12, %s1843_s12   ;;  %s1516_s11 = sphi %s1556_s11, %s1842_s11   ;;  %s1512_s10 = sphi %s1554_s10, %s1841_s10   ;;  %s1508_s9 = sphi %s1552_s9, %s1840_s9  }
   0x8   : > { %p53_p0 = scmp.ne.s32.totalorder %s1512_s10, %s1508_s9  ;;  %p1586_p1 = scmp.eq.s32.totalorder %s993_s15, 0 }
   0x9   : > { %p1590_p2 = scmp.eq.s32.totalorder %s993_s15, 1  ;;  %p109_p3 = scmp.eq.s32.totalorder %s994_s16, 1 }
   0xa   : > { %s1825_s17 = scalar_select %p1586_p1, 1, 0 }
   0xb   : > { %s1826_s18 = scalar_select %p1590_p2, 1, 0 }
   0xc   : > { %p1596_p4 = por %p1586_p1, %p53_p0  ;;  %p995_p5 = scmp.ge.s32.totalorder %s1528_s14, 1 }
   0xd   : > { %p1601_p6 = por %p109_p3, %p53_p0  ;;  %p116_p7 = scmp.lt.s32.totalorder %s1528_s14, 3 }
   0xe   : > { %s1827_s19 = scalar_select %p1596_p4, 1, 0 }
   0xf   : > { %s1828_s20 = scalar_select %p1601_p6, 1, 0 }
  0x10   : > { %p1606_p8 = pnand %p995_p5, %p116_p7  ;;  %s1530_s22 = smov [#allocation6]  }
  0x11   : > { %s131_s23 = sshll.u32 %s1530_s22, 4  ;;  %s31_s25 = sadd.s32 1, %s1524_s13  ;;  %s132_s23 = int_to_ptr.vmem [resolvable:$true] %s131_s23 }
  0x12   : > { %s1829_s21 = scalar_select %p1606_p8, 1, 0 }
  0x13   : > { %p1291_p9 = pneg %p1606_p8  ;;  %s1384_s28 = scalar_lea.hbm %s1819_s1, 1024 }
  0x14   : > { %p1385_p12 = scmp.ne.s32.totalorder %s1819_s1, %s1384_s28  ;;  %p1391_p5 = scmp.lt.u32.totalorder %s1384_s28, %s1819_s1 }
  0x15   : > { %p1615_p11 = pnand %p1291_p9, %p1586_p1 }
  0x17   : > { %p1386_p13 = pneg %p1615_p11 }
  0x19   : > { %p1387_p0 = pnand %p1386_p13, %p1385_p12 }
  0x1b   : > { %p1388_p3 = pneg %p1387_p0 }
  0x1d   : > { %p1393_p7 = pnand %p1391_p5, %p1388_p3 }
  0x1f   : > { %1396 = shalt.err (!%p1393_p7)
}
  0x20   : > { %s1397_s5 = scalar_lea.vmem %s132_s23, 1024  ;;  %p1405_p1 = scmp.lt.s32.totalorder %s132_s23, %s132_s23 }
  0x21   : > { %p1398_p9 = scmp.ne.s32.totalorder %s132_s23, %s1397_s5  ;;  %p1406_p4 = scmp.lt.s32.totalorder %s1397_s5, %s1397_s5 }
  0x23   : > { %p1400_p10 = pnand %p1398_p9, %p1386_p13  ;;  %p1407_p8 = por %p1406_p4, %p1405_p1 }
  0x25   : > { %p1401_p6 = pneg %p1400_p10 }
  0x27   : > { %p1408_p2 = pnand %p1407_p8, %p1401_p6 }
  0x29   : > { %1411 = shalt.err (!%p1408_p2)
}
  0x2a   : > { %s1531_s6 = smov 64   ;;  %s1532_s7 = smov 4  }
  0x2b   : > { %1294 = dma.hbm_to_vmem [thread:$0]  (!%p1615_p11), %s1819_s1, 1024, %s132_s23, [#allocation7], %s1531_s6, %s1531_s6, %s1532_s7  }
  0x2c   : > { %p33_p1 = scmp.ge.s32.totalorder %s31_s25, 2  ;;  %s40_s16 = sadd.s32 1, %s1516_s11 }
  0x2d   : > { %p47_p2 = scmp.ne.s32.totalorder %s1516_s11, %s1512_s10  ;;  %p48_p4 = scmp.eq.s32.totalorder %s1528_s14, 0 }
  0x2e   : > { %s1846_s25 = smov (%p33_p1, %s31_s25), 0  ;;  %p1832_p8 = scmp.ne.s32.totalorder %s1826_s18, 0 }
  0x2f   : > { %p1645_p6 = por %p48_p4, %p47_p2  ;;  %s35_s26 = ssub.s32 %s1524_s13, %s1846_s25 }
  0x30   : > { %p1651_p10 = por %p1832_p8, %p47_p2  ;;  %p1304_p12 = scmp.lt.s32.totalorder %s1528_s14, 2 }
  0x31   : > { %p38_p11 = scmp.eq.s32.totalorder %s35_s26, 0  ;;  %s145_s23 = sand.u32 1, %s1516_s11  }
  0x32   : > { %s998_s27 = sshll.u32 %s145_s23, 7  ;;  %s1066_s29 = sshll.u32 %s1524_s13, 11 }
  0x33   : > { %s1660_s28 = scalar_select %p38_p11, %s1516_s11, %s40_s16  }
  0x34   : > { %s1666_s4 = scalar_lea.hbm %s1818_s0, %s1066_s29  ;;  %s149_s18 = scalar_lea.vmem [#allocation3], %s998_s27 }
  0x35   : > { %s157_s5 = sshll.u32 %s149_s18, 4  ;;  %p1672_p13 = pnand %p1304_p12, %p1645_p6  ;;  %s1668_s5 = int_to_ptr.vmem [resolvable:$true] %s157_s5 }
  0x36   : > { %s1676_s15 = scalar_lea.sflag [#allocation4], %s145_s23  ;;  %s1412_s16 = scalar_lea.hbm %s1666_s4, 2048 }
  0x37   : > { %p1413_p0 = scmp.ne.s32.totalorder %s1666_s4, %s1412_s16  ;;  %p1414_p3 = pneg %p1672_p13 }
  0x38   : > { %s1417_s22 = scalar_lea.hbm %s1818_s0, 4096  ;;  %p1418_p9 = scmp.lt.u32.totalorder %s1666_s4, %s1818_s0 }
  0x39   : > { %p1415_p5 = pnand %p1414_p3, %p1413_p0  ;;  %p1419_p1 = scmp.lt.u32.totalorder %s1417_s22, %s1412_s16 }
  0x3a   : > { %p1421_p4 = scmp.lt.u32.totalorder %s1412_s16, %s1666_s4 }
  0x3b   : > { %p1416_p7 = pneg %p1415_p5  ;;  %p1420_p2 = por %p1419_p1, %p1418_p9 }
  0x3d   : > { %p1422_p6 = por %p1421_p4, %p1420_p2 }
  0x3f   : > { %p1423_p8 = pnand %p1422_p6, %p1416_p7 }
  0x41   : > { %1426 = shalt.err (!%p1423_p8)
}
  0x42   : > { %s1427_s23 = scalar_lea.vmem %s1668_s5, 2048  ;;  %s1533_s3 = smov [#allocation3]  }
  0x43   : > { %p1428_p12 = scmp.ne.s32.totalorder %s1668_s5, %s1427_s23  ;;  %s1432_s18 = sshll.u32 %s1533_s3, 4  ;;  %s1433_s18 = int_to_ptr.vmem [resolvable:$false] %s1432_s18 }
  0x44   : > { %s1434_s26 = scalar_lea.vmem %s1433_s18, 4096  ;;  %p1435_p5 = scmp.lt.s32.totalorder %s1668_s5, %s1433_s18 }
  0x45   : > { %p1430_p11 = pnand %p1428_p12, %p1414_p3  ;;  %p1436_p9 = scmp.lt.s32.totalorder %s1434_s26, %s1427_s23 }
  0x47   : > { %p1431_p0 = pneg %p1430_p11  ;;  %p1437_p1 = por %p1436_p9, %p1435_p5 }
  0x49   : > { %p1438_p2 = pnand %p1437_p1, %p1431_p0 }
  0x4b   : > { %1441 = shalt.err (!%p1438_p2)
}
  0x4c   : > { %1298 = dma.hbm_to_vmem [thread:$0]  (!%p1672_p13), %s1666_s4, 2048, %s1668_s5, %s1676_s15, %s1531_s6, %s1531_s6, %s1532_s7  }
  0x4d   : > { %p1835_p3 = scmp.ne.s32.totalorder %s1829_s21, 0 }
  0x4e   : > { %s1710_s16 = sand.u32 (!%p1835_p3), 1, %s1512_s10   ;;  %p1836_p7 = scmp.ne.s32.totalorder (!%p1835_p3), %s1827_s19, 0 }
  0x4f   : > { %169 = sbr.rel (%p1835_p3) target bundleno = 379 (0x17b), region = 28  ;;  %s1002_s27 = sshll.u32 (!%p1835_p3), %s1710_s16, 7 }
  0x50   : > { %s172_s22 = scalar_lea.sflag (!%p1835_p3), [#allocation4], %s1710_s16  ;;  %s1716_s8 = scalar_lea.vmem (!%p1835_p3), [#allocation3], %s1002_s27 }
  0x56   : > { %1495 = dma.done.wait (%p1836_p7), %s172_s22, 2048  }
  0x57   : > { %1497 = vsyncadd (%p1836_p7), %s172_s22, 4294965248  ;;  %p1837_p13 = scmp.ne.s32.totalorder %s1825_s17, 0 }
  0x59   : > { %1499 = dma.done.wait (%p1837_p13), [#allocation7], 1024  }
  0x5a   : > { %1501 = vsyncadd (%p1837_p13), [#allocation7], 4294966272  ;;  %v1360_v0 = vld [vmem:[#allocation6] sm:$0xff]   ;;  %v1361_v1 = vld [vmem:[#allocation6 + $0x8] sm:$0xff]   ;;  %s1744_s17 = scalar_lea.vmem [#allocation8], %s1002_s27  ;;  %s1099_s19 = sshll.u32 %s1520_s12, 11 }
  0x5b   : > { %1219 = vmatprep.subr.bf16.mxu0 %v1360_v0  ;;  %1267 = vmatprep.subr.bf16.mxu1 %v1360_v0  ;;  %v1362_v2 = vld [vmem:[#allocation6 + $0x10] sm:$0xff]   ;;  %v1363_v3 = vld [vmem:[#allocation6 + $0x18] sm:$0xff]   ;;  %v1368_v4 = vld [vmem:[%s1716_s8] sm:$0xff]   ;;  %s898_s21 = sshll.u32 %s1744_s17, 4  ;;  %s1763_s4 = scalar_lea.hbm %s1820_s2, %s1099_s19  ;;  %s1765_s21 = int_to_ptr.vmem [resolvable:$true] %s898_s21 }
  0x5c   : > { %1220 = vmatpush3.bf16.msra.mxu0 %v1360_v0  ;;  %1275 = vmatpush3.bf16.msra.mxu1 %v1360_v0  ;;  %v1369_v5 = vld [vmem:[%s1716_s8 + $0x40] sm:$0xff]   ;;  %v1365_v7 = vld [vmem:[#allocation6 + $0x28] sm:$0xff]   ;;  %v1366_v8 = vld [vmem:[#allocation6 + $0x30] sm:$0xff]   ;;  %s885_s12 = scalar_lea.sflag [#allocation5], %s1710_s16  ;;  %s1442_s5 = scalar_lea.vmem %s1765_s21, 2048 }
  0x5d   : > { %1221 = vmatprep.subr.bf16.mxu0 %v1361_v1  ;;  %1268 = vmatprep.subr.bf16.mxu1 %v1361_v1  ;;  %v1364_v6 = vld [vmem:[#allocation6 + $0x20] sm:$0xff]   ;;  %v1367_v9 = vld [vmem:[#allocation6 + $0x38] sm:$0xff]   ;;  %v1370_v10 = vld [vmem:[%s1716_s8 + $0x8] sm:$0xff]   ;;  %p1443_p4 = scmp.ne.s32.totalorder %s1765_s21, %s1442_s5  ;;  %s1534_s15 = smov [#allocation8]  }
  0x5e   : > { %1235 = vmatprep.mubr.bf16.mxu0 %v1368_v4  ;;  %1251 = vmatprep.mubr.bf16.mxu1 %v1369_v5  ;;  %v1371_v11 = vld [vmem:[%s1716_s8 + $0x48] sm:$0xff]   ;;  %v1372_v12 = vld [vmem:[%s1716_s8 + $0x10] sm:$0xff]   ;;  %v1374_v14 = vld [vmem:[%s1716_s8 + $0x18] sm:$0xff]   ;;  %s1446_s29 = sshll.u32 %s1534_s15, 4  ;;  %s1447_s29 = int_to_ptr.vmem [resolvable:$false] %s1446_s29 }
  0x5f   : > { %v1373_v13 = vld [vmem:[%s1716_s8 + $0x50] sm:$0xff]   ;;  %v1375_v15 = vld [vmem:[%s1716_s8 + $0x58] sm:$0xff]   ;;  %v1376_v16 = vld [vmem:[%s1716_s8 + $0x20] sm:$0xff]   ;;  %p1444_p6 = pnand %p1443_p4, %p1651_p10  ;;  %s1448_s30 = scalar_lea.vmem %s1447_s29, 4096 }
  0x60   : > { %1222 = vmatpush3.bf16.msra.mxu0 %v1361_v1  ;;  %1276 = vmatpush3.bf16.msra.mxu1 %v1361_v1  ;;  %v1377_v17 = vld [vmem:[%s1716_s8 + $0x60] sm:$0xff]   ;;  %v1378_v18 = vld [vmem:[%s1716_s8 + $0x28] sm:$0xff]   ;;  %v1380_v20 = vld [vmem:[%s1716_s8 + $0x30] sm:$0xff]   ;;  %p1449_p12 = scmp.lt.s32.totalorder %s1765_s21, %s1447_s29  ;;  %p1450_p11 = scmp.lt.s32.totalorder %s1448_s30, %s1442_s5 }
  0x61   : > { %1223 = vmatprep.subr.bf16.mxu0 %v1362_v2  ;;  %1269 = vmatprep.subr.bf16.mxu1 %v1362_v2  ;;  %v1379_v19 = vld [vmem:[%s1716_s8 + $0x68] sm:$0xff]   ;;  %v1381_v21 = vld [vmem:[%s1716_s8 + $0x70] sm:$0xff]   ;;  %v1382_v22 = vld [vmem:[%s1716_s8 + $0x38] sm:$0xff]   ;;  %p1445_p8 = pneg %p1444_p6 }
  0x62   : > { %v1383_v23 = vld [vmem:[%s1716_s8 + $0x78] sm:$0xff]   ;;  %p1451_p0 = por %p1450_p11, %p1449_p12 }
  0x64   : > { %1224 = vmatpush3.bf16.msra.mxu0 %v1362_v2  ;;  %1277 = vmatpush3.bf16.msra.mxu1 %v1362_v2  ;;  %p1452_p5 = pnand %p1451_p0, %p1445_p8 }
  0x65   : > { %1225 = vmatprep.subr.bf16.mxu0 %v1363_v3  ;;  %1270 = vmatprep.subr.bf16.mxu1 %v1363_v3 }
  0x68   : > { %1226 = vmatpush3.bf16.msra.mxu0 %v1363_v3  ;;  %1278 = vmatpush3.bf16.msra.mxu1 %v1363_v3 }
  0x69   : > { %1227 = vmatprep.subr.bf16.mxu0 %v1364_v6  ;;  %1271 = vmatprep.subr.bf16.mxu1 %v1364_v6 }
  0x6c   : > { %1228 = vmatpush3.bf16.msra.mxu0 %v1364_v6  ;;  %1279 = vmatpush3.bf16.msra.mxu1 %v1364_v6 }
  0x6d   : > { %1229 = vmatprep.subr.bf16.mxu0 %v1365_v7  ;;  %1272 = vmatprep.subr.bf16.mxu1 %v1365_v7 }
  0x70   : > { %1230 = vmatpush3.bf16.msra.mxu0 %v1365_v7  ;;  %1280 = vmatpush3.bf16.msra.mxu1 %v1365_v7 }
  0x71   : > { %1231 = vmatprep.subr.bf16.mxu0 %v1366_v8  ;;  %1273 = vmatprep.subr.bf16.mxu1 %v1366_v8 }
  0x74   : > { %1232 = vmatpush3.bf16.msra.mxu0 %v1366_v8  ;;  %1281 = vmatpush3.bf16.msra.mxu1 %v1366_v8 }
  0x75   : > { %1233 = vmatprep.subr.bf16.mxu0 %v1367_v9  ;;  %1274 = vmatprep.subr.bf16.mxu1 %v1367_v9 }
  0x78   : > { %1234 = vmatpush3.bf16.msra.mxu0 %v1367_v9  ;;  %1282 = vmatpush3.bf16.msra.mxu1 %v1367_v9 }
  0x7b   : > { %1236 = vmatmul.mubr.bf16.vlgmr.msra.gmra.mrb[0].mxu0 %v1370_v10  ;;  %1252 = vmatmul.mubr.bf16.vlgmr.msra.gmra.mrb[0].mxu1 %v1371_v11 }
  0x7c   : > { %1239 = vmatprep.mubr.bf16.mxu0 %v1372_v12  ;;  %1255 = vmatprep.mubr.bf16.mxu1 %v1373_v13 }
  0x83   : > { %1240 = vmatmul.mubr.bf16.gmra.mrb[4].mxu0 %v1374_v14  ;;  %1256 = vmatmul.mubr.bf16.gmra.mrb[4].mxu1 %v1375_v15 }
  0x84   : > { %1243 = vmatprep.mubr.bf16.mxu0 %v1376_v16  ;;  %1259 = vmatprep.mubr.bf16.mxu1 %v1377_v17 }
  0x8b   : > { %1244 = vmatmul.mubr.bf16.gmra.mrb[8].mxu0 %v1378_v18  ;;  %1260 = vmatmul.mubr.bf16.gmra.mrb[8].mxu1 %v1379_v19 }
  0x8c   : > { %1247 = vmatprep.mubr.bf16.mxu0 %v1380_v20  ;;  %1263 = vmatprep.mubr.bf16.mxu1 %v1381_v21 }
  0x93   : > { %1248 = vmatmul.mubr.bf16.gmra.mrb[12].mxu0 %v1382_v22  ;;  %1264 = vmatmul.mubr.bf16.gmra.mrb[12].mxu1 %v1383_v23 }
 0x14e   : > { %v1237_v24 = vpop.f32.mrb[0].mxu0  ;;  %v1253_v25 = vpop.f32.mrb[0].mxu1 }
 0x14f   : > { %v498_v26 = vpop.f32.mrb[1].mxu0  ;;  %v562_v27 = vpop.f32.mrb[1].mxu1 }
 0x150   : > { %v1238_v28 = vpop.f32.mrb[2].mxu0  ;;  %v1254_v29 = vpop.f32.mrb[2].mxu1 }
 0x151   : > { %v1108_v30 = vpack.c.bf16 %v1238_v28, %v1237_v24  ;;  %v1148_v31 = vpack.c.bf16 %v1254_v29, %v1253_v25  ;;  %v501_v32 = vpop.f32.mrb[3].mxu0  ;;  %v565_v33 = vpop.f32.mrb[3].mxu1 }
 0x152   : > { %v1103_v34 = vpack.c.bf16 %v501_v32, %v498_v26  ;;  %v1143_v35 = vpack.c.bf16 %v565_v33, %v562_v27 }
 0x153   : > { %1180 = vst [vmem:[%s1744_s17 + $0x8] sm:$0xff] %v1108_v30   ;;  %1188 = vst [vmem:[%s1744_s17 + $0x48] sm:$0xff] %v1148_v31  }
 0x154   : > { %1104 = vst [vmem:[%s1744_s17] sm:$0xff] %v1103_v34   ;;  %1187 = vst [vmem:[%s1744_s17 + $0x40] sm:$0xff] %v1143_v35  }
 0x156   : > { %v1241_v36 = vpop.f32.mrb[4].mxu0  ;;  %v1257_v37 = vpop.f32.mrb[4].mxu1 }
 0x157   : > { %v514_v38 = vpop.f32.mrb[5].mxu0  ;;  %v578_v39 = vpop.f32.mrb[5].mxu1 }
 0x158   : > { %v1242_v40 = vpop.f32.mrb[6].mxu0  ;;  %v1258_v41 = vpop.f32.mrb[6].mxu1 }
 0x159   : > { %v1118_v42 = vpack.c.bf16 %v1242_v40, %v1241_v36  ;;  %v1158_v43 = vpack.c.bf16 %v1258_v41, %v1257_v37  ;;  %v517_v44 = vpop.f32.mrb[7].mxu0  ;;  %v581_v45 = vpop.f32.mrb[7].mxu1 }
 0x15a   : > { %v1113_v46 = vpack.c.bf16 %v517_v44, %v514_v38  ;;  %v1153_v47 = vpack.c.bf16 %v581_v45, %v578_v39 }
 0x15b   : > { %1182 = vst [vmem:[%s1744_s17 + $0x18] sm:$0xff] %v1118_v42   ;;  %1190 = vst [vmem:[%s1744_s17 + $0x58] sm:$0xff] %v1158_v43  }
 0x15c   : > { %1181 = vst [vmem:[%s1744_s17 + $0x10] sm:$0xff] %v1113_v46   ;;  %1189 = vst [vmem:[%s1744_s17 + $0x50] sm:$0xff] %v1153_v47  }
 0x15e   : > { %v1245_v48 = vpop.f32.mrb[8].mxu0  ;;  %v1261_v49 = vpop.f32.mrb[8].mxu1 }
 0x15f   : > { %v530_v50 = vpop.f32.mrb[9].mxu0  ;;  %v594_v51 = vpop.f32.mrb[9].mxu1 }
 0x160   : > { %v1246_v52 = vpop.f32.mrb[10].mxu0  ;;  %v1262_v53 = vpop.f32.mrb[10].mxu1 }
 0x161   : > { %v1128_v54 = vpack.c.bf16 %v1246_v52, %v1245_v48  ;;  %v1168_v55 = vpack.c.bf16 %v1262_v53, %v1261_v49  ;;  %v533_v56 = vpop.f32.mrb[11].mxu0  ;;  %v597_v57 = vpop.f32.mrb[11].mxu1 }
 0x162   : > { %v1123_v58 = vpack.c.bf16 %v533_v56, %v530_v50  ;;  %v1163_v59 = vpack.c.bf16 %v597_v57, %v594_v51 }
 0x163   : > { %1184 = vst [vmem:[%s1744_s17 + $0x28] sm:$0xff] %v1128_v54   ;;  %1192 = vst [vmem:[%s1744_s17 + $0x68] sm:$0xff] %v1168_v55  }
 0x164   : > { %1183 = vst [vmem:[%s1744_s17 + $0x20] sm:$0xff] %v1123_v58   ;;  %1191 = vst [vmem:[%s1744_s17 + $0x60] sm:$0xff] %v1163_v59  }
 0x166   : > { %v1249_v60 = vpop.f32.mrb[12].mxu0  ;;  %v1265_v61 = vpop.f32.mrb[12].mxu1 }
 0x167   : > { %v546_v62 = vpop.f32.mrb[13].mxu0  ;;  %v610_v63 = vpop.f32.mrb[13].mxu1 }
 0x168   : > { %v1250_v0 = vpop.f32.mrb[14].mxu0  ;;  %v1266_v1 = vpop.f32.mrb[14].mxu1 }
 0x169   : > { %v1138_v2 = vpack.c.bf16 %v1250_v0, %v1249_v60  ;;  %v1178_v3 = vpack.c.bf16 %v1266_v1, %v1265_v61  ;;  %v549_v4 = vpop.f32.mrb[15].mxu0  ;;  %v613_v5 = vpop.f32.mrb[15].mxu1 }
 0x16a   : > { %v1133_v6 = vpack.c.bf16 %v549_v4, %v546_v62  ;;  %v1173_v7 = vpack.c.bf16 %v613_v5, %v610_v63 }
 0x16b   : > { %1186 = vst [vmem:[%s1744_s17 + $0x38] sm:$0xff] %v1138_v2   ;;  %1194 = vst [vmem:[%s1744_s17 + $0x78] sm:$0xff] %v1178_v3  }
 0x16c   : > { %1185 = vst [vmem:[%s1744_s17 + $0x30] sm:$0xff] %v1133_v6   ;;  %1193 = vst [vmem:[%s1744_s17 + $0x70] sm:$0xff] %v1173_v7  }
 0x16d   : > { %1455 = shalt.err (!%p1452_p5)
}
 0x16e   : > { %s1456_s23 = scalar_lea.hbm %s1763_s4, 2048  ;;  %s1460_s26 = scalar_lea.hbm %s1820_s2, 4096 }
 0x16f   : > { %p1457_p9 = scmp.ne.s32.totalorder %s1763_s4, %s1456_s23  ;;  %p1461_p3 = scmp.lt.u32.totalorder %s1763_s4, %s1820_s2 }
 0x170   : > { %p1462_p7 = scmp.lt.u32.totalorder %s1460_s26, %s1456_s23  ;;  %p1464_p4 = scmp.lt.u32.totalorder %s1456_s23, %s1763_s4 }
 0x171   : > { %p1458_p1 = pnand %p1457_p9, %p1651_p10 }
 0x172   : > { %p1463_p13 = por %p1462_p7, %p1461_p3 }
 0x173   : > { %p1459_p2 = pneg %p1458_p1 }
 0x174   : > { %p1465_p6 = por %p1464_p4, %p1463_p13 }
 0x176   : > { %p1466_p8 = pnand %p1465_p6, %p1459_p2 }
 0x178   : > { %1469 = shalt.err (!%p1466_p8)
}
 0x179   : > { %s1535_s8 = smov 64   ;;  %s1536_s17 = smov 4  }
 0x17a   : > { %1289 = dma.vmem_to_hbm [thread:$0]  (%p1651_p10), %s1765_s21, 2048, %s1763_s4, %s885_s12, %s1535_s8, %s1535_s8, %s1536_s17  }
 0x17b PF: > { %s913_s19 = sand.u32 1, %s1508_s9   ;;  %p1838_p12 = scmp.ne.s32.totalorder %s1828_s20, 0 }
 0x17c   : > { %p1839_p11 = scmp.ge.s32.totalorder %s1528_s14, 2  ;;  %s914_s6 = scalar_lea.sflag [#allocation5], %s913_s19 }
 0x17e   : > { %p1300_p0 = pnand %p1839_p11, %p1838_p12 }
 0x180   : > { %1503 = dma.done.wait (!%p1300_p0), %s914_s6, 2048  }
 0x181   : > { %1505 = vsyncadd (!%p1300_p0), %s914_s6, 4294965248  ;;  %s19_s14 = sadd.s32 1, %s1528_s14   ;;  %s1840_s9 = smov %s1512_s10 }
 0x182   : > { %p16_p5 = scmp.ge.s32.totalorder %s19_s14, 4   ;;  %s1841_s10 = smov %s1516_s11 }
 0x183   : > { %s1842_s11 = smov %s1660_s28  ;;  %s1843_s12 = smov %s1524_s13 }
 0x184   : > { %s1844_s13 = smov %s1846_s25  ;;  %18 = sbr.rel (!%p16_p5) target bundleno = 7 (0x7), region = 86 }
 0x18b   :  { %919 = vsyncpa [#allocation4], 1 }
 0x18c   :  { %921 = vsyncpa [#allocation4 + $0x1], 1 }
 0x18d   :  { %922 = vsyncpa [#allocation7], 1 }
 0x18e   :  { %923 = vsyncpa [#allocation5], 1 }
 0x18f   :  { %925 = vsyncpa [#allocation5 + $0x1], 1 }

</bundles_post_ra>
